<compile_context>
chip_gen: v6e
topology: v6e:2x2x1
jax: 0.10.0
libtpu: 0.0.40
codegen_flags: <defaults>
</compile_context>

<pallas_src>
import math

import jax
import jax.numpy as jnp
from jax.experimental import pallas as pl
from jax.experimental.pallas import tpu as pltpu

D_IN = 784
D_HID = 512
D_OUT = 10
D_IN_PAD = 896      # 7 * 128  -> lane-aligned, unmasked loads
D_OUT_PAD = 128     # lane-dense output block -> unmasked stores
_TM = 256           # batch tile for the large-batch (gridded) path
_SMALL_B = 512      # at/below this, run a single gridless call


def _round_up(n, m):
    return ((n + m - 1) // m) * m


def _mlp_kernel(x_ref, w1_ref, b1_ref, w2_ref, b2_ref, o_ref):
    # Layer 1 on the MXU: bf16 operands, f32 accumulate.
    h = jnp.dot(x_ref[...], w1_ref[...], preferred_element_type=jnp.float32)
    # Bias + ReLU in f32 on the VPU.
    h = jnp.maximum(h + b1_ref[...], 0.0)
    # Layer 2: bf16 x bf16 on the MXU, f32 accumulate. h never touches HBM.
    out = jnp.dot(h.astype(jnp.bfloat16), w2_ref[...],
                  preferred_element_type=jnp.float32)
    o_ref[...] = (out + b2_ref[...]).astype(o_ref.dtype)


def init_params(key):
    """PyTorch Linear default init: U(-1/sqrt(fan_in), 1/sqrt(fan_in)), f32."""
    k1, k2, k3, k4 = jax.random.split(key, 4)
    bound1 = 1.0 / math.sqrt(float(D_IN))
    bound2 = 1.0 / math.sqrt(float(D_HID))
    # Stored as (in, out) = PyTorch weight.T
    w1 = jax.random.uniform(k1, (D_IN, D_HID), jnp.float32, -bound1, bound1)
    b1 = jax.random.uniform(k2, (1, D_HID), jnp.float32, -bound1, bound1)
    w2 = jax.random.uniform(k3, (D_HID, D_OUT), jnp.float32, -bound2, bound2)
    b2 = jax.random.uniform(k4, (1, D_OUT), jnp.float32, -bound2, bound2)
    return w1, b1, w2, b2


def prepare_params(w1, b1, w2, b2):
    """One-time (model-load) padding + bf16 cast of the weights.

    Zero-padding D_in 784->896 and D_out 10->128 changes no math (padded
    rows / columns contribute 0) but gives lane-aligned loads and lane-dense
    stores. Halving weight bytes (f32 -> bf16) is the main win: this kernel
    is HBM-bound and w1 dominates traffic.
    """
    w1p = jnp.zeros((D_IN_PAD, D_HID), jnp.bfloat16)
    w1p = w1p.at[:D_IN, :].set(w1.astype(jnp.bfloat16))
    b1p = b1.reshape(1, D_HID).astype(jnp.float32)
    w2p = jnp.zeros((D_HID, D_OUT_PAD), jnp.bfloat16)
    w2p = w2p.at[:, :D_OUT].set(w2.astype(jnp.bfloat16))
    b2p = jnp.zeros((1, D_OUT_PAD), jnp.float32)
    b2p = b2p.at[:, :D_OUT].set(b2.reshape(1, D_OUT))
    return w1p, b1p, w2p, b2p


def _pad_input(x, b_pad):
    x_p = jnp.zeros((b_pad, D_IN_PAD), jnp.bfloat16)
    return x_p.at[:x.shape[0], :D_IN].set(x.astype(jnp.bfloat16))


def net_forward(x, params):
    """x: (B, 784) f32. Returns (B, 10) f32 == relu(x @ W1 + b1) @ W2 + b2."""
    w1p, b1p, w2p, b2p = params
    B = x.shape[0]
    assert x.shape[1] == D_IN

    if B <= _SMALL_B:
        # Whole problem fits comfortably in VMEM: single gridless call.
        b_pad = _round_up(B, 8)
        x_p = _pad_input(x, b_pad)
        vmem = pltpu.MemorySpace.VMEM
        out = pl.pallas_call(
            _mlp_kernel,
            out_shape=jax.ShapeDtypeStruct((b_pad, D_OUT_PAD), jnp.float32),
            in_specs=[pl.BlockSpec(memory_space=vmem)] * 5,
            out_specs=pl.BlockSpec(memory_space=vmem),
        )(x_p, w1p, b1p, w2p, b2p)
    else:
        # Batch-tiled path: x/out tiled along B, weights VMEM-resident
        # (constant index_map); "parallel" lets v7x shard batch across its
        # 2 TensorCores.
        tm = _TM
        b_pad = _round_up(B, tm)
        x_p = _pad_input(x, b_pad)
        out = pl.pallas_call(
            _mlp_kernel,
            out_shape=jax.ShapeDtypeStruct((b_pad, D_OUT_PAD), jnp.float32),
            grid=(b_pad // tm,),
            in_specs=[
                pl.BlockSpec((tm, D_IN_PAD), lambda i: (i, 0)),
                pl.BlockSpec((D_IN_PAD, D_HID), lambda i: (0, 0)),
                pl.BlockSpec((1, D_HID), lambda i: (0, 0)),
                pl.BlockSpec((D_HID, D_OUT_PAD), lambda i: (0, 0)),
                pl.BlockSpec((1, D_OUT_PAD), lambda i: (0, 0)),
            ],
            out_specs=pl.BlockSpec((tm, D_OUT_PAD), lambda i: (i, 0)),
            compiler_params=pltpu.CompilerParams(
                dimension_semantics=("parallel",)),
        )(x_p, w1p, b1p, w2p, b2p)

    return out[:B, :D_OUT]


if __name__ == "__main__":
    key = jax.random.PRNGKey(0)
    k_x, k_p = jax.random.split(key)

    B = 8  # small batch
    x = jax.random.normal(k_x, (B, D_IN), jnp.float32)
    w1, b1, w2, b2 = init_params(k_p)
    params = prepare_params(w1, b1, w2, b2)

    fwd = jax.jit(net_forward)

    # Small-batch (gridless) path.
    out = jax.block_until_ready(fwd(x, params))
    ref = jnp.maximum(x @ w1 + b1, 0.0) @ w2 + b2
    assert out.shape == (B, D_OUT)
    # bf16 matmul operands with f32 accumulation -> relaxed tolerance vs f32 ref.
    assert jnp.allclose(out, ref, atol=5e-2, rtol=5e-2), float(
        jnp.max(jnp.abs(out - ref)))

    # Exercise the batch-tiled ("parallel" grid) path too.
    B2 = 600
    x2 = jax.random.normal(jax.random.PRNGKey(1), (B2, D_IN), jnp.float32)
    out2 = jax.block_until_ready(fwd(x2, params))
    ref2 = jnp.maximum(x2 @ w1 + b1, 0.0) @ w2 + b2
    assert out2.shape == (B2, D_OUT)
    assert jnp.allclose(out2, ref2, atol=5e-2, rtol=5e-2), float(
        jnp.max(jnp.abs(out2 - ref2)))

    print("KERNEL_OK")
</pallas_src>

<mosaic_0001>
module attributes {stable_mosaic.version = 11 : i64} {
  func.func @_mlp_kernel(%arg0: memref<8x896xbf16, #tpu.memory_space<vmem>>, %arg1: memref<896x512xbf16, #tpu.memory_space<vmem>>, %arg2: memref<1x512xf32, #tpu.memory_space<vmem>>, %arg3: memref<512x128xbf16, #tpu.memory_space<vmem>>, %arg4: memref<1x128xf32, #tpu.memory_space<vmem>>, %arg5: memref<8x128xf32, #tpu.memory_space<vmem>>) attributes {dimension_semantics = [], scalar_prefetch = 0 : i64, scratch_operands = 0 : i64, tpu.core_type = #tpu.core_type<tc>} {
    %c0 = arith.constant 0 : index
    %c0_0 = arith.constant 0 : index
    %0 = vector.load %arg0[%c0, %c0_0] : memref<8x896xbf16, #tpu.memory_space<vmem>>, vector<8x896xbf16>
    %c0_1 = arith.constant 0 : index
    %c0_2 = arith.constant 0 : index
    %1 = vector.load %arg1[%c0_1, %c0_2] : memref<896x512xbf16, #tpu.memory_space<vmem>>, vector<896x512xbf16>
    %cst = arith.constant dense<0.000000e+00> : vector<8x512xf32>
    %2 = tpu.matmul %0, %1, %cst {dimension_numbers = #tpu.dot_dimension_numbers<[1], [0], [0], [1], [0, 0, 1, 1], [], []>} : vector<8x896xbf16>, vector<896x512xbf16>, vector<8x512xf32> -> vector<8x512xf32>
    %c0_3 = arith.constant 0 : index
    %c0_4 = arith.constant 0 : index
    %3 = vector.load %arg2[%c0_3, %c0_4] : memref<1x512xf32, #tpu.memory_space<vmem>>, vector<1x512xf32>
    %4 = vector.broadcast %3 : vector<1x512xf32> to vector<8x512xf32>
    %5 = arith.addf %2, %4 : vector<8x512xf32>
    %cst_5 = arith.constant 0.000000e+00 : f32
    %6 = vector.broadcast %cst_5 : f32 to vector<8x512xf32>
    %7 = arith.maximumf %5, %6 : vector<8x512xf32>
    %8 = arith.truncf %7 : vector<8x512xf32> to vector<8x512xbf16>
    %c0_6 = arith.constant 0 : index
    %c0_7 = arith.constant 0 : index
    %9 = vector.load %arg3[%c0_6, %c0_7] : memref<512x128xbf16, #tpu.memory_space<vmem>>, vector<512x128xbf16>
    %cst_8 = arith.constant dense<0.000000e+00> : vector<8x128xf32>
    %10 = tpu.matmul %8, %9, %cst_8 {dimension_numbers = #tpu.dot_dimension_numbers<[1], [0], [0], [1], [0, 0, 1, 1], [], []>} : vector<8x512xbf16>, vector<512x128xbf16>, vector<8x128xf32> -> vector<8x128xf32>
    %c0_9 = arith.constant 0 : index
    %c0_10 = arith.constant 0 : index
    %11 = vector.load %arg4[%c0_9, %c0_10] : memref<1x128xf32, #tpu.memory_space<vmem>>, vector<1x128xf32>
    %12 = vector.broadcast %11 : vector<1x128xf32> to vector<8x128xf32>
    %13 = arith.addf %10, %12 : vector<8x128xf32>
    %c0_11 = arith.constant 0 : index
    %c0_12 = arith.constant 0 : index
    %14 = vector.load %arg5[%c0_11, %c0_12] : memref<8x128xf32, #tpu.memory_space<vmem>>, vector<8x128xf32>
    tpu.vector_store %arg5[%c0_11, %c0_12], %13 {strides = array<i32>} : memref<8x128xf32, #tpu.memory_space<vmem>>, vector<8x128xf32>,
    return
  }
}

</mosaic_0001>

<bundles_post_ra>
// kernel: net_forward.1
= control target key start
LH: loop header
LB: loop body
LE: loop exit
PB: predicated region body
PF: predicated region fallthrough
CT: control target
= control target key end

     0   :  { %10 = vsyncpa [#allocation3], 0  ;;  %s2999_s0 = inlined_call_operand.vmem [shape: bf16[8,896], index: 0, kind: input, shape index: {}]   ;;  %s3000_s1 = inlined_call_operand.hbm [shape: bf16[896,512], index: 1, kind: input, shape index: {}]   ;;  %s3001_s2 = inlined_call_operand.vmem [shape: f32[1,512], index: 2, kind: input, shape index: {}]   ;;  %s3002_s3 = inlined_call_operand.hbm [shape: bf16[512,128], index: 3, kind: input, shape index: {}]   ;;  %s3003_s4 = inlined_call_operand.vmem [shape: f32[1,128], index: 4, kind: input, shape index: {}]   ;;  %s3004_s5 = inlined_call_operand.hbm [shape: f32[8,128], index: 5, kind: output, shape index: {}]  }
   0x1   :  { %11 = vsyncpa [#allocation6], 0 }
   0x2   :  { %12 = vsyncpa [#allocation4], 0  ;;  %s2898_s18 = smov [#allocation2]  }
   0x3   :  { %s20_s19 = sshll.u32 %s2898_s18, 4  ;;  %s21_s19 = int_to_ptr.vmem [resolvable:$true] %s20_s19 }
   0x4   :  { %s2840_s20 = scalar_lea.vmem %s21_s19, 28672  ;;  %p2845_p1 = scmp.lt.s32.totalorder %s21_s19, %s21_s19 }
   0x5   :  { %p2841_p0 = scmp.ne.s32.totalorder %s21_s19, %s2840_s20  ;;  %p2846_p2 = scmp.lt.s32.totalorder %s2840_s20, %s2840_s20 }
   0x7   :  { %p2847_p3 = por %p2846_p2, %p2845_p1 }
   0x9   :  { %p2848_p4 = pnand %p2847_p3, %p2841_p0 }
   0xb   :  { %2851 = shalt.err (!%p2848_p4)
}
   0xc   :  { %s2899_s21 = smov 256   ;;  %s2900_s22 = smov 16  }
   0xd   :  { %26 = dma.hbm_to_vmem [thread:$0]  %s3000_s1, 28672, %s21_s19, [#allocation3], %s2899_s21, %s2899_s21, %s2900_s22  }
   0xe   :  { %s2901_s25 = smov [#allocation5]  }
   0xf   :  { %s34_s26 = sshll.u32 %s2901_s25, 4  ;;  %s35_s26 = int_to_ptr.vmem [resolvable:$true] %s34_s26 }
  0x10   :  { %s2860_s27 = scalar_lea.vmem %s35_s26, 4096  ;;  %p2865_p6 = scmp.lt.s32.totalorder %s35_s26, %s35_s26 }
  0x11   :  { %p2861_p5 = scmp.ne.s32.totalorder %s35_s26, %s2860_s27  ;;  %p2866_p7 = scmp.lt.s32.totalorder %s2860_s27, %s2860_s27 }
  0x13   :  { %p2867_p8 = por %p2866_p7, %p2865_p6 }
  0x15   :  { %p2868_p9 = pnand %p2867_p8, %p2861_p5 }
  0x17   :  { %2871 = shalt.err (!%p2868_p9)
}
  0x18   :  { %s2902_s28 = smov 64   ;;  %s2903_s29 = smov 4  }
  0x19   :  { %40 = dma.hbm_to_vmem [thread:$0]  %s3002_s3, 4096, %s35_s26, [#allocation6], %s2902_s28, %s2902_s28, %s2903_s29  }
  0x1a   :  { %2892 = dma.done.wait [#allocation3], 28672  }
  0x1b   :  { %2893 = vsyncadd [#allocation3], 4294938624 }
  0x1c   :  { %2894 = dma.done.wait [#allocation6], 4096  }
  0x1d   :  { %2895 = vsyncadd [#allocation6], 4294963200  ;;  %v2457_v0 = vld [vmem:[#allocation2 + $0xe4] ss:$16 sps:$4 sm:$0xff]   ;;  %v2461_v2 = vld [vmem:[#allocation2 + $0xe0] ss:$16 sps:$4 sm:$0xff]  }
  0x1e   :  { %v2459_v1 = vld [vmem:[#allocation2 + $0x2e4] ss:$16 sps:$4 sm:$0xff]   ;;  %1445 = vmatprep.subr.bf16.mxu0 %v2457_v0  ;;  %v2462_v3 = vld [vmem:[#allocation2 + $0x2e0] ss:$16 sps:$4 sm:$0xff]   ;;  %v51_v48 = vld [vmem:[%s2999_s0 + $0x8] sm:$0xff]  ;;  %s2905_s15 = smov [#allocation7]  }
  0x1f   :  { %1486 = vmatprep.subr.bf16.mxu1 %v2459_v1  ;;  %v2463_v4 = vld [vmem:[#allocation2 + $0xc4] ss:$16 sps:$4 sm:$0xff]   ;;  %1446 = vmatpush1.bf16.msra.mxu0 %v2461_v2  ;;  %v2467_v6 = vld [vmem:[#allocation2 + $0xc0] ss:$16 sps:$4 sm:$0xff]   ;;  %v2950_v51 = vcombine.high %v51_v48, %v51_v48  ;;  %s2131_s16 = sshll.u32 %s2905_s15, 4  ;;  %s2132_s16 = int_to_ptr.vmem [resolvable:$true] %s2131_s16 }
  0x20   :  { %1487 = vmatpush1.bf16.msra.mxu1 %v2462_v3  ;;  %v2465_v5 = vld [vmem:[#allocation2 + $0x2c4] ss:$16 sps:$4 sm:$0xff]   ;;  %1447 = vmatprep.subr.bf16.mxu0 %v2463_v4  ;;  %v2468_v7 = vld [vmem:[#allocation2 + $0x2c0] ss:$16 sps:$4 sm:$0xff]   ;;  %s2872_s17 = scalar_lea.vmem %s2132_s16, 128  ;;  %p2877_p11 = scmp.lt.s32.totalorder %s2132_s16, %s2132_s16 }
  0x21   :  { %1488 = vmatprep.subr.bf16.mxu1 %v2465_v5  ;;  %v2469_v8 = vld [vmem:[#allocation2 + $0xa4] ss:$16 sps:$4 sm:$0xff]   ;;  %v2473_v10 = vld [vmem:[#allocation2 + $0xa0] ss:$16 sps:$4 sm:$0xff]   ;;  %1518 = vmatprep.mubr.bf16.mxu1 %v2950_v51  ;;  %p2873_p10 = scmp.ne.s32.totalorder %s2132_s16, %s2872_s17  ;;  %p2878_p12 = scmp.lt.s32.totalorder %s2872_s17, %s2872_s17 }
  0x22   :  { %v2471_v9 = vld [vmem:[#allocation2 + $0x2a4] ss:$16 sps:$4 sm:$0xff]   ;;  %v2474_v11 = vld [vmem:[#allocation2 + $0x2a0] ss:$16 sps:$4 sm:$0xff]  }
  0x23   :  { %1448 = vmatpush1.bf16.msra.mxu0 %v2467_v6  ;;  %v2475_v12 = vld [vmem:[#allocation2 + $0x84] ss:$16 sps:$4 sm:$0xff]   ;;  %v2479_v14 = vld [vmem:[#allocation2 + $0x80] ss:$16 sps:$4 sm:$0xff]   ;;  %p2879_p13 = por %p2878_p12, %p2877_p11 }
  0x24   :  { %1489 = vmatpush1.bf16.msra.mxu1 %v2468_v7  ;;  %1449 = vmatprep.subr.bf16.mxu0 %v2469_v8  ;;  %v2477_v13 = vld [vmem:[#allocation2 + $0x284] ss:$16 sps:$4 sm:$0xff]   ;;  %v2480_v15 = vld [vmem:[#allocation2 + $0x280] ss:$16 sps:$4 sm:$0xff]   ;;  %v2956_v7 = vcombine.low %v51_v48, %v51_v48  ;;  %v2617_v48 = vld [vmem:[#allocation2 + $0xcc] ss:$16 sps:$4 sm:$0xff]  }
  0x25   :  { %1490 = vmatprep.subr.bf16.mxu1 %v2471_v9  ;;  %v2481_v16 = vld [vmem:[#allocation2 + $0x64] ss:$16 sps:$4 sm:$0xff]   ;;  %v2485_v18 = vld [vmem:[#allocation2 + $0x60] ss:$16 sps:$4 sm:$0xff]   ;;  %p2880_p0 = pnand %p2879_p13, %p2873_p10 }
  0x26   :  { %v2483_v17 = vld [vmem:[#allocation2 + $0x264] ss:$16 sps:$4 sm:$0xff]   ;;  %v2486_v19 = vld [vmem:[#allocation2 + $0x260] ss:$16 sps:$4 sm:$0xff]  }
  0x27   :  { %1450 = vmatpush1.bf16.msra.mxu0 %v2473_v10  ;;  %v2487_v20 = vld [vmem:[#allocation2 + $0x44] ss:$16 sps:$4 sm:$0xff]   ;;  %v2491_v22 = vld [vmem:[#allocation2 + $0x40] ss:$16 sps:$4 sm:$0xff]  }
  0x28   :  { %1491 = vmatpush1.bf16.msra.mxu1 %v2474_v11  ;;  %1451 = vmatprep.subr.bf16.mxu0 %v2475_v12  ;;  %v2489_v21 = vld [vmem:[#allocation2 + $0x244] ss:$16 sps:$4 sm:$0xff]   ;;  %v2492_v23 = vld [vmem:[#allocation2 + $0x240] ss:$16 sps:$4 sm:$0xff]  }
  0x29   :  { %1492 = vmatprep.subr.bf16.mxu1 %v2477_v13  ;;  %v2493_v24 = vld [vmem:[#allocation2 + $0x24] ss:$16 sps:$4 sm:$0xff]   ;;  %v2497_v26 = vld [vmem:[#allocation2 + $0x20] ss:$16 sps:$4 sm:$0xff]  }
  0x2a   :  { %v2495_v25 = vld [vmem:[#allocation2 + $0x224] ss:$16 sps:$4 sm:$0xff]   ;;  %v2498_v27 = vld [vmem:[#allocation2 + $0x220] ss:$16 sps:$4 sm:$0xff]  }
  0x2b   :  { %1452 = vmatpush1.bf16.msra.mxu0 %v2479_v14  ;;  %v2499_v28 = vld [vmem:[#allocation2 + $0x4] ss:$16 sps:$4 sm:$0xff]   ;;  %v2503_v30 = vld [vmem:[#allocation2] ss:$16 sps:$4 sm:$0xff]  }
  0x2c   :  { %1493 = vmatpush1.bf16.msra.mxu1 %v2480_v15  ;;  %1453 = vmatprep.subr.bf16.mxu0 %v2481_v16  ;;  %v2501_v29 = vld [vmem:[#allocation2 + $0x204] ss:$16 sps:$4 sm:$0xff]   ;;  %v2504_v31 = vld [vmem:[#allocation2 + $0x200] ss:$16 sps:$4 sm:$0xff]   ;;  %v2904_v16 = vmov 0  }
  0x2d   :  { %1494 = vmatprep.subr.bf16.mxu1 %v2483_v17  ;;  %v2505_v32 = vld [vmem:[#allocation2 + $0x1e4] ss:$16 sps:$4 sm:$0xff]   ;;  %v2509_v34 = vld [vmem:[#allocation2 + $0x1e0] ss:$16 sps:$4 sm:$0xff]  }
  0x2e   :  { %v2507_v33 = vld [vmem:[#allocation2 + $0x3e4] ss:$16 sps:$4 sm:$0xff]   ;;  %v2510_v35 = vld [vmem:[#allocation2 + $0x3e0] ss:$16 sps:$4 sm:$0xff]  }
  0x2f   :  { %1454 = vmatpush1.bf16.msra.mxu0 %v2485_v18  ;;  %v2511_v36 = vld [vmem:[#allocation2 + $0x1c4] ss:$16 sps:$4 sm:$0xff]   ;;  %v2515_v38 = vld [vmem:[#allocation2 + $0x1c0] ss:$16 sps:$4 sm:$0xff]  }
  0x30   :  { %1495 = vmatpush1.bf16.msra.mxu1 %v2486_v19  ;;  %1455 = vmatprep.subr.bf16.mxu0 %v2487_v20  ;;  %v2513_v37 = vld [vmem:[#allocation2 + $0x3c4] ss:$16 sps:$4 sm:$0xff]   ;;  %v2516_v39 = vld [vmem:[#allocation2 + $0x3c0] ss:$16 sps:$4 sm:$0xff]  }
  0x31   :  { %1496 = vmatprep.subr.bf16.mxu1 %v2489_v21  ;;  %v2517_v40 = vld [vmem:[#allocation2 + $0x1a4] ss:$16 sps:$4 sm:$0xff]   ;;  %v2521_v42 = vld [vmem:[#allocation2 + $0x1a0] ss:$16 sps:$4 sm:$0xff]  }
  0x32   :  { %v2519_v41 = vld [vmem:[#allocation2 + $0x3a4] ss:$16 sps:$4 sm:$0xff]   ;;  %v2522_v43 = vld [vmem:[#allocation2 + $0x3a0] ss:$16 sps:$4 sm:$0xff]  }
  0x33   :  { %1456 = vmatpush1.bf16.msra.mxu0 %v2491_v22  ;;  %v2523_v44 = vld [vmem:[#allocation2 + $0x184] ss:$16 sps:$4 sm:$0xff]   ;;  %v2527_v49 = vld [vmem:[#allocation2 + $0x180] ss:$16 sps:$4 sm:$0xff]  }
  0x34   :  { %1497 = vmatpush1.bf16.msra.mxu1 %v2492_v23  ;;  %1457 = vmatprep.subr.bf16.mxu0 %v2493_v24  ;;  %v2525_v45 = vld [vmem:[#allocation2 + $0x384] ss:$16 sps:$4 sm:$0xff]   ;;  %v2528_v50 = vld [vmem:[#allocation2 + $0x380] ss:$16 sps:$4 sm:$0xff]  }
  0x35   :  { %1498 = vmatprep.subr.bf16.mxu1 %v2495_v25  ;;  %v50_v46 = vld [vmem:[%s2999_s0] sm:$0xff] }
  0x36   :  { %v2945_v47 = vcombine.high %v50_v46, %v50_v46  ;;  %v2529_v52 = vld [vmem:[#allocation2 + $0x164] ss:$16 sps:$4 sm:$0xff]   ;;  %v2533_v54 = vld [vmem:[#allocation2 + $0x160] ss:$16 sps:$4 sm:$0xff]   ;;  %v2954_v6 = vcombine.low %v50_v46, %v50_v46 }
  0x37   :  { %1458 = vmatpush1.bf16.msra.mxu0 %v2497_v26  ;;  %v2531_v53 = vld [vmem:[#allocation2 + $0x364] ss:$16 sps:$4 sm:$0xff]   ;;  %v2534_v55 = vld [vmem:[#allocation2 + $0x360] ss:$16 sps:$4 sm:$0xff]  }
  0x38   :  { %1499 = vmatpush1.bf16.msra.mxu1 %v2498_v27  ;;  %1459 = vmatprep.subr.bf16.mxu0 %v2499_v28  ;;  %v2535_v56 = vld [vmem:[#allocation2 + $0x144] ss:$16 sps:$4 sm:$0xff]   ;;  %v2539_v58 = vld [vmem:[#allocation2 + $0x140] ss:$16 sps:$4 sm:$0xff]  }
  0x39   :  { %1500 = vmatprep.subr.bf16.mxu1 %v2501_v29  ;;  %1477 = vmatprep.mubr.bf16.mxu0 %v2945_v47  ;;  %v2537_v57 = vld [vmem:[#allocation2 + $0x344] ss:$16 sps:$4 sm:$0xff]   ;;  %v2540_v59 = vld [vmem:[#allocation2 + $0x340] ss:$16 sps:$4 sm:$0xff]  }
  0x3a   :  { %v2541_v60 = vld [vmem:[#allocation2 + $0x124] ss:$16 sps:$4 sm:$0xff]   ;;  %v2545_v62 = vld [vmem:[#allocation2 + $0x120] ss:$16 sps:$4 sm:$0xff]  }
  0x3b   :  { %1460 = vmatpush1.bf16.msra.mxu0 %v2503_v30  ;;  %v2543_v61 = vld [vmem:[#allocation2 + $0x324] ss:$16 sps:$4 sm:$0xff]   ;;  %v2546_v63 = vld [vmem:[#allocation2 + $0x320] ss:$16 sps:$4 sm:$0xff]  }
  0x3c   :  { %1501 = vmatpush1.bf16.msra.mxu1 %v2504_v31  ;;  %1461 = vmatprep.subr.bf16.mxu0 %v2505_v32  ;;  %v2547_v0 = vld [vmem:[#allocation2 + $0x104] ss:$16 sps:$4 sm:$0xff]   ;;  %v2551_v2 = vld [vmem:[#allocation2 + $0x100] ss:$16 sps:$4 sm:$0xff]  }
  0x3d   :  { %1502 = vmatprep.subr.bf16.mxu1 %v2507_v33  ;;  %v2549_v1 = vld [vmem:[#allocation2 + $0x304] ss:$16 sps:$4 sm:$0xff]   ;;  %v2552_v3 = vld [vmem:[#allocation2 + $0x300] ss:$16 sps:$4 sm:$0xff]  }
  0x3e   :  { %v2559_v4 = vld [vmem:[#allocation2 + $0x4e4] ss:$16 sps:$4 sm:$0xff]   ;;  %v2557_v8 = vld [vmem:[#allocation2 + $0x4e0] ss:$16 sps:$4 sm:$0xff]  }
  0x3f   :  { %1462 = vmatpush2.bf16.msra.mxu0 %v2509_v34  ;;  %v2562_v5 = vld [vmem:[#allocation2 + $0x6e4] ss:$16 sps:$4 sm:$0xff]   ;;  %v2560_v9 = vld [vmem:[#allocation2 + $0x6e0] ss:$16 sps:$4 sm:$0xff]  }
  0x40   :  { %1503 = vmatpush2.bf16.msra.mxu1 %v2510_v35  ;;  %1463 = vmatprep.subr.bf16.mxu0 %v2511_v36  ;;  %v2565_v10 = vld [vmem:[#allocation2 + $0x4c4] ss:$16 sps:$4 sm:$0xff]   ;;  %v2563_v12 = vld [vmem:[#allocation2 + $0x4c0] ss:$16 sps:$4 sm:$0xff]  }
  0x41   :  { %1504 = vmatprep.subr.bf16.mxu1 %v2513_v37  ;;  %v2568_v11 = vld [vmem:[#allocation2 + $0x6c4] ss:$16 sps:$4 sm:$0xff]   ;;  %v2566_v13 = vld [vmem:[#allocation2 + $0x6c0] ss:$16 sps:$4 sm:$0xff]  }
  0x42   :  { %v2571_v14 = vld [vmem:[#allocation2 + $0x4a4] ss:$16 sps:$4 sm:$0xff]   ;;  %v2569_v17 = vld [vmem:[#allocation2 + $0x4a0] ss:$16 sps:$4 sm:$0xff]  }
  0x43   :  { %1464 = vmatpush2.bf16.msra.mxu0 %v2515_v38  ;;  %v2574_v15 = vld [vmem:[#allocation2 + $0x6a4] ss:$16 sps:$4 sm:$0xff]   ;;  %v2572_v18 = vld [vmem:[#allocation2 + $0x6a0] ss:$16 sps:$4 sm:$0xff]  }
  0x44   :  { %1505 = vmatpush2.bf16.msra.mxu1 %v2516_v39  ;;  %1465 = vmatprep.subr.bf16.mxu0 %v2517_v40  ;;  %v2577_v19 = vld [vmem:[#allocation2 + $0x484] ss:$16 sps:$4 sm:$0xff]   ;;  %v2575_v21 = vld [vmem:[#allocation2 + $0x480] ss:$16 sps:$4 sm:$0xff]  }
  0x45   :  { %1506 = vmatprep.subr.bf16.mxu1 %v2519_v41  ;;  %v2580_v20 = vld [vmem:[#allocation2 + $0x684] ss:$16 sps:$4 sm:$0xff]   ;;  %v2578_v22 = vld [vmem:[#allocation2 + $0x680] ss:$16 sps:$4 sm:$0xff]  }
  0x46   :  { %v2583_v23 = vld [vmem:[#allocation2 + $0x464] ss:$16 sps:$4 sm:$0xff]   ;;  %v2581_v25 = vld [vmem:[#allocation2 + $0x460] ss:$16 sps:$4 sm:$0xff]  }
  0x47   :  { %1466 = vmatpush2.bf16.msra.mxu0 %v2521_v42  ;;  %v2586_v24 = vld [vmem:[#allocation2 + $0x664] ss:$16 sps:$4 sm:$0xff]   ;;  %v2584_v26 = vld [vmem:[#allocation2 + $0x660] ss:$16 sps:$4 sm:$0xff]   ;;  %v2611_v42 = vld [vmem:[#allocation2 + $0xec] ss:$16 sps:$4 sm:$0xff]  }
  0x48   :  { %1507 = vmatpush2.bf16.msra.mxu1 %v2522_v43  ;;  %1467 = vmatprep.subr.bf16.mxu0 %v2523_v44  ;;  %v2589_v27 = vld [vmem:[#allocation2 + $0x444] ss:$16 sps:$4 sm:$0xff]   ;;  %v2587_v29 = vld [vmem:[#allocation2 + $0x440] ss:$16 sps:$4 sm:$0xff]   ;;  %v2974_v44 = vld [vmem:[%s2999_s0 + $0x18] ss:$0 sps:$4 sm:$0xff]  }
  0x49   :  { %1508 = vmatprep.subr.bf16.mxu1 %v2525_v45  ;;  %v2592_v28 = vld [vmem:[#allocation2 + $0x644] ss:$16 sps:$4 sm:$0xff]   ;;  %v2590_v30 = vld [vmem:[#allocation2 + $0x640] ss:$16 sps:$4 sm:$0xff]   ;;  %v2609_v45 = vld [vmem:[#allocation2 + $0xe8] ss:$16 sps:$4 sm:$0xff]  }
  0x4a   :  { %v2595_v31 = vld [vmem:[#allocation2 + $0x424] ss:$16 sps:$4 sm:$0xff]   ;;  %v2593_v34 = vld [vmem:[#allocation2 + $0x420] ss:$16 sps:$4 sm:$0xff]  }
  0x4b   :  { %1468 = vmatpush2.bf16.msra.mxu0 %v2527_v49  ;;  %v2598_v32 = vld [vmem:[#allocation2 + $0x624] ss:$16 sps:$4 sm:$0xff]   ;;  %v2596_v36 = vld [vmem:[#allocation2 + $0x620] ss:$16 sps:$4 sm:$0xff]  }
  0x4c   :  { %1509 = vmatpush2.bf16.msra.mxu1 %v2528_v50  ;;  %1469 = vmatprep.subr.bf16.mxu0 %v2529_v52  ;;  %v2964_v33 = vld [vmem:[%s2999_s0 + $0x10] sm:$0xff]  ;;  %v2615_v50 = vld [vmem:[#allocation2 + $0xc8] ss:$16 sps:$4 sm:$0xff]  }
  0x4d   :  { %1510 = vmatprep.subr.bf16.mxu1 %v2531_v53  ;;  %v2968_v35 = vcombine.high %v2964_v33, %v2964_v33  ;;  %v2601_v37 = vld [vmem:[#allocation2 + $0x404] ss:$16 sps:$4 sm:$0xff]   ;;  %v2599_v39 = vld [vmem:[#allocation2 + $0x400] ss:$16 sps:$4 sm:$0xff]   ;;  %v2623_v53 = vld [vmem:[#allocation2 + $0xac] ss:$16 sps:$4 sm:$0xff]  }
  0x4e   :  { %v2604_v38 = vld [vmem:[#allocation2 + $0x604] ss:$16 sps:$4 sm:$0xff]   ;;  %v2602_v40 = vld [vmem:[#allocation2 + $0x600] ss:$16 sps:$4 sm:$0xff]  }
  0x4f   :  { %1470 = vmatpush2.bf16.msra.mxu0 %v2533_v54  ;;  %v2607_v41 = vld [vmem:[#allocation2 + $0x5e4] ss:$16 sps:$4 sm:$0xff]   ;;  %v2605_v43 = vld [vmem:[#allocation2 + $0x5e0] ss:$16 sps:$4 sm:$0xff]  }
  0x50   :  { %1511 = vmatpush2.bf16.msra.mxu1 %v2534_v55  ;;  %1471 = vmatprep.subr.bf16.mxu0 %v2535_v56  ;;  %v2614_v46 = vld [vmem:[#allocation2 + $0x5c4] ss:$16 sps:$4 sm:$0xff]   ;;  %v2612_v49 = vld [vmem:[#allocation2 + $0x5c0] ss:$16 sps:$4 sm:$0xff]   ;;  %v2621_v55 = vld [vmem:[#allocation2 + $0xa8] ss:$16 sps:$4 sm:$0xff]  }
  0x51   :  { %1512 = vmatprep.subr.bf16.mxu1 %v2537_v57  ;;  %v2620_v52 = vld [vmem:[#allocation2 + $0x5a4] ss:$16 sps:$4 sm:$0xff]   ;;  %v2618_v54 = vld [vmem:[#allocation2 + $0x5a0] ss:$16 sps:$4 sm:$0xff]   ;;  %v2629_v57 = vld [vmem:[#allocation2 + $0x8c] ss:$16 sps:$4 sm:$0xff]  }
  0x52   :  { %v2626_v56 = vld [vmem:[#allocation2 + $0x584] ss:$16 sps:$4 sm:$0xff]  }
  0x53   :  { %1472 = vmatpush2.bf16.msra.mxu0 %v2539_v58  ;;  %v2624_v58 = vld [vmem:[#allocation2 + $0x580] ss:$16 sps:$4 sm:$0xff]  }
  0x54   :  { %1513 = vmatpush2.bf16.msra.mxu1 %v2540_v59  ;;  %1473 = vmatprep.subr.bf16.mxu0 %v2541_v60  ;;  %v2627_v59 = vld [vmem:[#allocation2 + $0x88] ss:$16 sps:$4 sm:$0xff]   ;;  %v2632_v60 = vld [vmem:[#allocation2 + $0x564] ss:$16 sps:$4 sm:$0xff]  }
  0x55   :  { %1514 = vmatprep.subr.bf16.mxu1 %v2543_v61  ;;  %v2635_v61 = vld [vmem:[#allocation2 + $0x6c] ss:$16 sps:$4 sm:$0xff]  }
  0x57   :  { %1474 = vmatpush2.bf16.msra.mxu0 %v2545_v62  ;;  %v2630_v62 = vld [vmem:[#allocation2 + $0x560] ss:$16 sps:$4 sm:$0xff]  }
  0x58   :  { %1515 = vmatpush2.bf16.msra.mxu1 %v2546_v63  ;;  %1475 = vmatprep.subr.bf16.mxu0 %v2547_v0  ;;  %v2638_v63 = vld [vmem:[#allocation2 + $0x544] ss:$16 sps:$4 sm:$0xff]   ;;  %v2641_v0 = vld [vmem:[#allocation2 + $0x4c] ss:$16 sps:$4 sm:$0xff]  }
  0x59   :  { %1516 = vmatprep.subr.bf16.mxu1 %v2549_v1  ;;  %v2636_v1 = vld [vmem:[#allocation2 + $0x540] ss:$16 sps:$4 sm:$0xff]  }
  0x5b   :  { %1476 = vmatpush2.bf16.msra.mxu0 %v2551_v2  ;;  %v2639_v2 = vld [vmem:[#allocation2 + $0x48] ss:$16 sps:$4 sm:$0xff]  }
  0x5c   :  { %1517 = vmatpush2.bf16.msra.mxu1 %v2552_v3  ;;  %1527 = vmatprep.subr.bf16.mxu0 %v2559_v4  ;;  %v2644_v3 = vld [vmem:[#allocation2 + $0x524] ss:$16 sps:$4 sm:$0xff]   ;;  %v2647_v4 = vld [vmem:[#allocation2 + $0x2c] ss:$16 sps:$4 sm:$0xff]  }
  0x5d   :  { %1568 = vmatprep.subr.bf16.mxu1 %v2562_v5  ;;  %v2642_v5 = vld [vmem:[#allocation2 + $0x520] ss:$16 sps:$4 sm:$0xff]  }
  0x5e   :  { %1478 = vmatmul.mubr.bf16.vlgmr.msra.gmra.mxu0 %v2954_v6 }
  0x5f   :  { %1519 = vmatmul.mubr.bf16.vlgmr.msra.gmra.mxu1 %v2956_v7  ;;  %1528 = vmatpush1.bf16.msra.mxu0 %v2557_v8  ;;  %v2645_v8 = vld [vmem:[#allocation2 + $0x28] ss:$16 sps:$4 sm:$0xff]  }
  0x60   :  { %1569 = vmatpush1.bf16.msra.mxu1 %v2560_v9  ;;  %1529 = vmatprep.subr.bf16.mxu0 %v2565_v10  ;;  %v2650_v9 = vld [vmem:[#allocation2 + $0x504] ss:$16 sps:$4 sm:$0xff]   ;;  %v2653_v10 = vld [vmem:[#allocation2 + $0xc] ss:$16 sps:$4 sm:$0xff]  }
  0x61   :  { %1570 = vmatprep.subr.bf16.mxu1 %v2568_v11  ;;  %1600 = vmatprep.mubr.bf16.mxu1 %v2904_v16  ;;  %v2648_v11 = vld [vmem:[#allocation2 + $0x500] ss:$16 sps:$4 sm:$0xff]  }
  0x62   :  { %1559 = vmatprep.mubr.bf16.mxu0 %v2968_v35 }
  0x63   :  { %1530 = vmatpush1.bf16.msra.mxu0 %v2563_v12  ;;  %v2651_v12 = vld [vmem:[#allocation2 + $0x8] ss:$16 sps:$4 sm:$0xff]  }
  0x64   :  { %1571 = vmatpush1.bf16.msra.mxu1 %v2566_v13  ;;  %1531 = vmatprep.subr.bf16.mxu0 %v2571_v14  ;;  %v2658_v13 = vld [vmem:[#allocation2 + $0x1ec] ss:$16 sps:$4 sm:$0xff]  }
  0x65   :  { %1572 = vmatprep.subr.bf16.mxu1 %v2574_v15  ;;  %v2661_v14 = vld [vmem:[#allocation2 + $0x2ec] ss:$16 sps:$4 sm:$0xff]   ;;  %v2980_v15 = vcombine.low %v2964_v33, %v2964_v33  ;;  %v2680_v33 = vld [vmem:[#allocation2 + $0x168] ss:$16 sps:$4 sm:$0xff]  }
  0x67   :  { %1532 = vmatpush1.bf16.msra.mxu0 %v2569_v17  ;;  %v2656_v17 = vld [vmem:[#allocation2 + $0x1e8] ss:$16 sps:$4 sm:$0xff]  }
  0x68   :  { %1573 = vmatpush1.bf16.msra.mxu1 %v2572_v18  ;;  %1533 = vmatprep.subr.bf16.mxu0 %v2577_v19  ;;  %v2659_v18 = vld [vmem:[#allocation2 + $0x2e8] ss:$16 sps:$4 sm:$0xff]   ;;  %v2664_v19 = vld [vmem:[#allocation2 + $0x1cc] ss:$16 sps:$4 sm:$0xff]  }
  0x69   :  { %1574 = vmatprep.subr.bf16.mxu1 %v2580_v20  ;;  %v2667_v20 = vld [vmem:[#allocation2 + $0x2cc] ss:$16 sps:$4 sm:$0xff]  }
  0x6b   :  { %1534 = vmatpush1.bf16.msra.mxu0 %v2575_v21  ;;  %v2662_v21 = vld [vmem:[#allocation2 + $0x1c8] ss:$16 sps:$4 sm:$0xff]  }
  0x6c   :  { %1575 = vmatpush1.bf16.msra.mxu1 %v2578_v22  ;;  %1535 = vmatprep.subr.bf16.mxu0 %v2583_v23  ;;  %v2665_v22 = vld [vmem:[#allocation2 + $0x2c8] ss:$16 sps:$4 sm:$0xff]   ;;  %v2670_v23 = vld [vmem:[#allocation2 + $0x1ac] ss:$16 sps:$4 sm:$0xff]  }
  0x6d   :  { %1576 = vmatprep.subr.bf16.mxu1 %v2586_v24  ;;  %v2673_v24 = vld [vmem:[#allocation2 + $0x2ac] ss:$16 sps:$4 sm:$0xff]  }
  0x6f   :  { %1536 = vmatpush1.bf16.msra.mxu0 %v2581_v25  ;;  %v2668_v25 = vld [vmem:[#allocation2 + $0x1a8] ss:$16 sps:$4 sm:$0xff]  }
  0x70   :  { %1577 = vmatpush1.bf16.msra.mxu1 %v2584_v26  ;;  %1537 = vmatprep.subr.bf16.mxu0 %v2589_v27  ;;  %v2671_v26 = vld [vmem:[#allocation2 + $0x2a8] ss:$16 sps:$4 sm:$0xff]   ;;  %v2676_v27 = vld [vmem:[#allocation2 + $0x18c] ss:$16 sps:$4 sm:$0xff]  }
  0x71   :  { %1578 = vmatprep.subr.bf16.mxu1 %v2592_v28  ;;  %v2679_v28 = vld [vmem:[#allocation2 + $0x28c] ss:$16 sps:$4 sm:$0xff]  }
  0x73   :  { %1538 = vmatpush1.bf16.msra.mxu0 %v2587_v29  ;;  %v2674_v29 = vld [vmem:[#allocation2 + $0x188] ss:$16 sps:$4 sm:$0xff]  }
  0x74   :  { %1579 = vmatpush1.bf16.msra.mxu1 %v2590_v30  ;;  %1539 = vmatprep.subr.bf16.mxu0 %v2595_v31  ;;  %v2677_v30 = vld [vmem:[#allocation2 + $0x288] ss:$16 sps:$4 sm:$0xff]   ;;  %v2682_v31 = vld [vmem:[#allocation2 + $0x16c] ss:$16 sps:$4 sm:$0xff]  }
  0x75   :  { %1580 = vmatprep.subr.bf16.mxu1 %v2598_v32  ;;  %v2685_v32 = vld [vmem:[#allocation2 + $0x26c] ss:$16 sps:$4 sm:$0xff]  }
  0x77   :  { %1540 = vmatpush1.bf16.msra.mxu0 %v2593_v34  ;;  %v2688_v34 = vld [vmem:[#allocation2 + $0x14c] ss:$16 sps:$4 sm:$0xff]  }
  0x78   :  { %1581 = vmatpush1.bf16.msra.mxu1 %v2596_v36  ;;  %1541 = vmatprep.subr.bf16.mxu0 %v2601_v37  ;;  %v2691_v36 = vld [vmem:[#allocation2 + $0x24c] ss:$16 sps:$4 sm:$0xff]   ;;  %v2686_v37 = vld [vmem:[#allocation2 + $0x148] ss:$16 sps:$4 sm:$0xff]  }
  0x79   :  { %1582 = vmatprep.subr.bf16.mxu1 %v2604_v38  ;;  %v2689_v38 = vld [vmem:[#allocation2 + $0x248] ss:$16 sps:$4 sm:$0xff]  }
  0x7b   :  { %1542 = vmatpush1.bf16.msra.mxu0 %v2599_v39  ;;  %v2694_v39 = vld [vmem:[#allocation2 + $0x12c] ss:$16 sps:$4 sm:$0xff]  }
  0x7c   :  { %1583 = vmatpush1.bf16.msra.mxu1 %v2602_v40  ;;  %1543 = vmatprep.subr.bf16.mxu0 %v2607_v41  ;;  %v2697_v40 = vld [vmem:[#allocation2 + $0x22c] ss:$16 sps:$4 sm:$0xff]   ;;  %v2692_v41 = vld [vmem:[#allocation2 + $0x128] ss:$16 sps:$4 sm:$0xff]  }
  0x7d   :  { %1609 = vmatprep.subr.bf16.mxu1 %v2611_v42  ;;  %v2695_v42 = vld [vmem:[#allocation2 + $0x228] ss:$16 sps:$4 sm:$0xff]  }
  0x7f   :  { %1601 = vmatmul.mubr.bf16.vlgmr.msra.gmra.mxu1 %v2974_v44  ;;  %1544 = vmatpush2.bf16.msra.mxu0 %v2605_v43  ;;  %v2700_v43 = vld [vmem:[#allocation2 + $0x10c] ss:$16 sps:$4 sm:$0xff]  }
  0x80   :  { %1610 = vmatpush1.bf16.msra.mxu1 %v2609_v45  ;;  %1545 = vmatprep.subr.bf16.mxu0 %v2614_v46  ;;  %v2703_v45 = vld [vmem:[#allocation2 + $0x20c] ss:$16 sps:$4 sm:$0xff]   ;;  %v2698_v46 = vld [vmem:[#allocation2 + $0x108] ss:$16 sps:$4 sm:$0xff]  }
  0x81   :  { %1611 = vmatprep.subr.bf16.mxu1 %v2617_v48  ;;  %1641 = vmatprep.mubr.bf16.mxu1 %v2945_v47  ;;  %v2633_v47 = vld [vmem:[#allocation2 + $0x68] ss:$16 sps:$4 sm:$0xff]  }
  0x82   :  { %v2701_v48 = vld [vmem:[#allocation2 + $0x208] ss:$16 sps:$4 sm:$0xff]  }
  0x83   :  { %1546 = vmatpush2.bf16.msra.mxu0 %v2612_v49  ;;  %v2706_v49 = vld [vmem:[#allocation2 + $0x3ec] ss:$16 sps:$4 sm:$0xff]  }
  0x84   :  { %1612 = vmatpush1.bf16.msra.mxu1 %v2615_v50  ;;  %1547 = vmatprep.subr.bf16.mxu0 %v2620_v52  ;;  %v2709_v50 = vld [vmem:[#allocation2 + $0x4ec] ss:$16 sps:$4 sm:$0xff]   ;;  %v2704_v52 = vld [vmem:[#allocation2 + $0x3e8] ss:$16 sps:$4 sm:$0xff]  }
  0x85   :  { %1613 = vmatprep.subr.bf16.mxu1 %v2623_v53  ;;  %v2707_v53 = vld [vmem:[#allocation2 + $0x4e8] ss:$16 sps:$4 sm:$0xff]  }
  0x87   :  { %1548 = vmatpush2.bf16.msra.mxu0 %v2618_v54  ;;  %v2712_v54 = vld [vmem:[#allocation2 + $0x3cc] ss:$16 sps:$4 sm:$0xff]  }
  0x88   :  { %1614 = vmatpush1.bf16.msra.mxu1 %v2621_v55  ;;  %1549 = vmatprep.subr.bf16.mxu0 %v2626_v56  ;;  %v2715_v55 = vld [vmem:[#allocation2 + $0x4cc] ss:$16 sps:$4 sm:$0xff]   ;;  %v2710_v56 = vld [vmem:[#allocation2 + $0x3c8] ss:$16 sps:$4 sm:$0xff]  }
  0x89   :  { %1615 = vmatprep.subr.bf16.mxu1 %v2629_v57  ;;  %v2713_v57 = vld [vmem:[#allocation2 + $0x4c8] ss:$16 sps:$4 sm:$0xff]  }
  0x8b   :  { %1550 = vmatpush2.bf16.msra.mxu0 %v2624_v58  ;;  %v2718_v58 = vld [vmem:[#allocation2 + $0x3ac] ss:$16 sps:$4 sm:$0xff]  }
  0x8c   :  { %1616 = vmatpush1.bf16.msra.mxu1 %v2627_v59  ;;  %1551 = vmatprep.subr.bf16.mxu0 %v2632_v60  ;;  %v2721_v59 = vld [vmem:[#allocation2 + $0x4ac] ss:$16 sps:$4 sm:$0xff]   ;;  %v2716_v60 = vld [vmem:[#allocation2 + $0x3a8] ss:$16 sps:$4 sm:$0xff]  }
  0x8d   :  { %1617 = vmatprep.subr.bf16.mxu1 %v2635_v61  ;;  %v2719_v61 = vld [vmem:[#allocation2 + $0x4a8] ss:$16 sps:$4 sm:$0xff]  }
  0x8f   :  { %1552 = vmatpush2.bf16.msra.mxu0 %v2630_v62  ;;  %v2724_v62 = vld [vmem:[#allocation2 + $0x38c] ss:$16 sps:$4 sm:$0xff]  }
  0x90   :  { %1618 = vmatpush1.bf16.msra.mxu1 %v2633_v47  ;;  %1553 = vmatprep.subr.bf16.mxu0 %v2638_v63  ;;  %v2727_v47 = vld [vmem:[#allocation2 + $0x48c] ss:$16 sps:$4 sm:$0xff]   ;;  %v2722_v63 = vld [vmem:[#allocation2 + $0x388] ss:$16 sps:$4 sm:$0xff]  }
  0x91   :  { %1619 = vmatprep.subr.bf16.mxu1 %v2641_v0  ;;  %v2725_v0 = vld [vmem:[#allocation2 + $0x488] ss:$16 sps:$4 sm:$0xff]  }
  0x93   :  { %1554 = vmatpush2.bf16.msra.mxu0 %v2636_v1  ;;  %v2730_v1 = vld [vmem:[#allocation2 + $0x36c] ss:$16 sps:$4 sm:$0xff]  }
  0x94   :  { %1620 = vmatpush1.bf16.msra.mxu1 %v2639_v2  ;;  %1555 = vmatprep.subr.bf16.mxu0 %v2644_v3  ;;  %v2728_v2 = vld [vmem:[#allocation2 + $0x368] ss:$16 sps:$4 sm:$0xff]  }
  0x95   :  { %1621 = vmatprep.subr.bf16.mxu1 %v2647_v4  ;;  %v2731_v3 = vld [vmem:[#allocation2 + $0x468] ss:$16 sps:$4 sm:$0xff]   ;;  %v2739_v4 = vld [vmem:[#allocation2 + $0x44c] ss:$16 sps:$4 sm:$0xff]  }
  0x97   :  { %1556 = vmatpush2.bf16.msra.mxu0 %v2642_v5  ;;  %v2734_v5 = vld [vmem:[#allocation2 + $0x348] ss:$16 sps:$4 sm:$0xff]  }
  0x98   :  { %1622 = vmatpush1.bf16.msra.mxu1 %v2645_v8  ;;  %1557 = vmatprep.subr.bf16.mxu0 %v2650_v9  ;;  %v2737_v8 = vld [vmem:[#allocation2 + $0x448] ss:$16 sps:$4 sm:$0xff]   ;;  %v2742_v9 = vld [vmem:[#allocation2 + $0x32c] ss:$16 sps:$4 sm:$0xff]  }
  0x99   :  { %1623 = vmatprep.subr.bf16.mxu1 %v2653_v10  ;;  %v2745_v10 = vld [vmem:[#allocation2 + $0x42c] ss:$16 sps:$4 sm:$0xff]  }
  0x9b   :  { %1558 = vmatpush2.bf16.msra.mxu0 %v2648_v11  ;;  %v2740_v11 = vld [vmem:[#allocation2 + $0x328] ss:$16 sps:$4 sm:$0xff]  }
  0x9c   :  { %1624 = vmatpush1.bf16.msra.mxu1 %v2651_v12  ;;  %1650 = vmatprep.subr.bf16.mxu0 %v2661_v14  ;;  %v2743_v12 = vld [vmem:[#allocation2 + $0x428] ss:$16 sps:$4 sm:$0xff]   ;;  %v2751_v14 = vld [vmem:[#allocation2 + $0x40c] ss:$16 sps:$4 sm:$0xff]  }
  0x9d   :  { %1625 = vmatprep.subr.bf16.mxu1 %v2658_v13  ;;  %v2748_v13 = vld [vmem:[#allocation2 + $0x30c] ss:$16 sps:$4 sm:$0xff]  }
  0x9e   :  { %1560 = vmatmul.mubr.bf16.vlgmr.msra.gmra.mxu0 %v2980_v15 }
  0x9f   :  { %1651 = vmatpush1.bf16.msra.mxu0 %v2659_v18  ;;  %1682 = vmatprep.mubr.bf16.mxu0 %v2950_v51  ;;  %v2683_v51 = vld [vmem:[#allocation2 + $0x268] ss:$16 sps:$4 sm:$0xff]  }
  0xa0   :  { %1626 = vmatpush2.bf16.msra.mxu1 %v2656_v17  ;;  %1652 = vmatprep.subr.bf16.mxu0 %v2667_v20  ;;  %v2746_v17 = vld [vmem:[#allocation2 + $0x308] ss:$16 sps:$4 sm:$0xff]   ;;  %v2757_v20 = vld [vmem:[#allocation2 + $0x6ec] ss:$16 sps:$4 sm:$0xff]  }
  0xa1   :  { %1627 = vmatprep.subr.bf16.mxu1 %v2664_v19  ;;  %v2749_v18 = vld [vmem:[#allocation2 + $0x408] ss:$16 sps:$4 sm:$0xff]   ;;  %v2754_v19 = vld [vmem:[#allocation2 + $0x5ec] ss:$16 sps:$4 sm:$0xff]  }
  0xa3   :  { %1653 = vmatpush1.bf16.msra.mxu0 %v2665_v22  ;;  %v2755_v22 = vld [vmem:[#allocation2 + $0x6e8] ss:$16 sps:$4 sm:$0xff]  }
  0xa4   :  { %1628 = vmatpush2.bf16.msra.mxu1 %v2662_v21  ;;  %1654 = vmatprep.subr.bf16.mxu0 %v2673_v24  ;;  %v2752_v21 = vld [vmem:[#allocation2 + $0x5e8] ss:$16 sps:$4 sm:$0xff]   ;;  %v2763_v24 = vld [vmem:[#allocation2 + $0x6cc] ss:$16 sps:$4 sm:$0xff]  }
  0xa5   :  { %1629 = vmatprep.subr.bf16.mxu1 %v2670_v23  ;;  %v2760_v23 = vld [vmem:[#allocation2 + $0x5cc] ss:$16 sps:$4 sm:$0xff]  }
  0xa7   :  { %1655 = vmatpush1.bf16.msra.mxu0 %v2671_v26  ;;  %v2761_v26 = vld [vmem:[#allocation2 + $0x6c8] ss:$16 sps:$4 sm:$0xff]  }
  0xa8   :  { %1630 = vmatpush2.bf16.msra.mxu1 %v2668_v25  ;;  %1656 = vmatprep.subr.bf16.mxu0 %v2679_v28  ;;  %v2758_v25 = vld [vmem:[#allocation2 + $0x5c8] ss:$16 sps:$4 sm:$0xff]   ;;  %v2769_v28 = vld [vmem:[#allocation2 + $0x6ac] ss:$16 sps:$4 sm:$0xff]  }
  0xa9   :  { %1631 = vmatprep.subr.bf16.mxu1 %v2676_v27  ;;  %v2766_v27 = vld [vmem:[#allocation2 + $0x5ac] ss:$16 sps:$4 sm:$0xff]  }
  0xab   :  { %1657 = vmatpush1.bf16.msra.mxu0 %v2677_v30  ;;  %v2767_v30 = vld [vmem:[#allocation2 + $0x6a8] ss:$16 sps:$4 sm:$0xff]  }
  0xac   :  { %1632 = vmatpush2.bf16.msra.mxu1 %v2674_v29  ;;  %1658 = vmatprep.subr.bf16.mxu0 %v2685_v32  ;;  %v2764_v29 = vld [vmem:[#allocation2 + $0x5a8] ss:$16 sps:$4 sm:$0xff]   ;;  %v2775_v32 = vld [vmem:[#allocation2 + $0x68c] ss:$16 sps:$4 sm:$0xff]  }
  0xad   :  { %1633 = vmatprep.subr.bf16.mxu1 %v2682_v31  ;;  %v2772_v31 = vld [vmem:[#allocation2 + $0x58c] ss:$16 sps:$4 sm:$0xff]  }
  0xaf   :  { %1659 = vmatpush1.bf16.msra.mxu0 %v2683_v51  ;;  %v2778_v51 = vld [vmem:[#allocation2 + $0x56c] ss:$16 sps:$4 sm:$0xff]  }
  0xb0   :  { %1634 = vmatpush2.bf16.msra.mxu1 %v2680_v33  ;;  %1660 = vmatprep.subr.bf16.mxu0 %v2691_v36  ;;  %v2773_v33 = vld [vmem:[#allocation2 + $0x688] ss:$16 sps:$4 sm:$0xff]  }
  0xb1   :  { %1635 = vmatprep.subr.bf16.mxu1 %v2688_v34  ;;  %v2781_v34 = vld [vmem:[#allocation2 + $0x66c] ss:$16 sps:$4 sm:$0xff]   ;;  %v2776_v36 = vld [vmem:[#allocation2 + $0x568] ss:$16 sps:$4 sm:$0xff]  }
  0xb3   :  { %1661 = vmatpush1.bf16.msra.mxu0 %v2689_v38  ;;  %v2787_v38 = vld [vmem:[#allocation2 + $0x64c] ss:$16 sps:$4 sm:$0xff]  }
  0xb4   :  { %1636 = vmatpush2.bf16.msra.mxu1 %v2686_v37  ;;  %1662 = vmatprep.subr.bf16.mxu0 %v2697_v40  ;;  %v2784_v37 = vld [vmem:[#allocation2 + $0x54c] ss:$16 sps:$4 sm:$0xff]   ;;  %v2785_v40 = vld [vmem:[#allocation2 + $0x648] ss:$16 sps:$4 sm:$0xff]  }
  0xb5   :  { %1637 = vmatprep.subr.bf16.mxu1 %v2694_v39  ;;  %v2782_v39 = vld [vmem:[#allocation2 + $0x548] ss:$16 sps:$4 sm:$0xff]  }
  0xb7   :  { %1663 = vmatpush1.bf16.msra.mxu0 %v2695_v42  ;;  %v2793_v42 = vld [vmem:[#allocation2 + $0x62c] ss:$16 sps:$4 sm:$0xff]  }
  0xb8   :  { %1638 = vmatpush2.bf16.msra.mxu1 %v2692_v41  ;;  %1664 = vmatprep.subr.bf16.mxu0 %v2703_v45  ;;  %v2790_v41 = vld [vmem:[#allocation2 + $0x52c] ss:$16 sps:$4 sm:$0xff]   ;;  %v2791_v45 = vld [vmem:[#allocation2 + $0x628] ss:$16 sps:$4 sm:$0xff]  }
  0xb9   :  { %1639 = vmatprep.subr.bf16.mxu1 %v2700_v43  ;;  %v2788_v43 = vld [vmem:[#allocation2 + $0x528] ss:$16 sps:$4 sm:$0xff]  }
  0xbb   :  { %1665 = vmatpush1.bf16.msra.mxu0 %v2701_v48  ;;  %v2799_v48 = vld [vmem:[#allocation2 + $0x60c] ss:$16 sps:$4 sm:$0xff]  }
  0xbc   :  { %1640 = vmatpush2.bf16.msra.mxu1 %v2698_v46  ;;  %1666 = vmatprep.subr.bf16.mxu0 %v2706_v49  ;;  %v2796_v46 = vld [vmem:[#allocation2 + $0x50c] ss:$16 sps:$4 sm:$0xff]   ;;  %v2794_v49 = vld [vmem:[#allocation2 + $0x508] ss:$16 sps:$4 sm:$0xff]  }
  0xbd   :  { %1691 = vmatprep.subr.bf16.mxu1 %v2709_v50  ;;  %v2797_v50 = vld [vmem:[#allocation2 + $0x608] ss:$16 sps:$4 sm:$0xff]  }
  0xbf   :  { %1642 = vmatmul.mubr.bf16.vlgmr.msra.gmra.mxu1 %v2954_v6  ;;  %1667 = vmatpush2.bf16.msra.mxu0 %v2704_v52  ;;  %v2733_v6 = vld [vmem:[#allocation2 + $0x46c] ss:$16 sps:$4 sm:$0xff]  }
  0xc0   :  { %1692 = vmatpush1.bf16.msra.mxu1 %v2707_v53  ;;  %1668 = vmatprep.subr.bf16.mxu0 %v2712_v54  ;;  %v2800_v52 = vld [vmem:[#allocation5 + $0x78] sm:$0xff]   ;;  %v2802_v54 = vld [vmem:[#allocation5 + $0x70] sm:$0xff]  }
  0xc1   :  { %1693 = vmatprep.subr.bf16.mxu1 %v2715_v55  ;;  %1723 = vmatprep.mubr.bf16.mxu1 %v2968_v35  ;;  %v2736_v35 = vld [vmem:[#allocation2 + $0x34c] ss:$16 sps:$4 sm:$0xff]   ;;  %v2803_v55 = vld [vmem:[#allocation5 + $0x30] sm:$0xff]  }
  0xc2   :  { %v2801_v53 = vld [vmem:[#allocation5 + $0x38] sm:$0xff]  }
  0xc3   :  { %1669 = vmatpush2.bf16.msra.mxu0 %v2710_v56  ;;  %v2804_v56 = vld [vmem:[#allocation5 + $0x68] sm:$0xff]  }
  0xc4   :  { %1694 = vmatpush1.bf16.msra.mxu1 %v2713_v57  ;;  %1670 = vmatprep.subr.bf16.mxu0 %v2718_v58  ;;  %v2805_v57 = vld [vmem:[#allocation5 + $0x28] sm:$0xff]   ;;  %v2806_v58 = vld [vmem:[#allocation5 + $0x60] sm:$0xff]  }
  0xc5   :  { %1695 = vmatprep.subr.bf16.mxu1 %v2721_v59  ;;  %v2807_v59 = vld [vmem:[#allocation5 + $0x20] sm:$0xff]  }
  0xc7   :  { %1671 = vmatpush2.bf16.msra.mxu0 %v2716_v60  ;;  %v2808_v60 = vld [vmem:[#allocation5 + $0x58] sm:$0xff]  }
  0xc8   :  { %1696 = vmatpush1.bf16.msra.mxu1 %v2719_v61  ;;  %1672 = vmatprep.subr.bf16.mxu0 %v2724_v62  ;;  %v2809_v61 = vld [vmem:[#allocation5 + $0x18] sm:$0xff]   ;;  %v2810_v62 = vld [vmem:[#allocation5 + $0x50] sm:$0xff]  }
  0xc9   :  { %1697 = vmatprep.subr.bf16.mxu1 %v2727_v47  ;;  %v2813_v47 = vld [vmem:[#allocation5 + $0x8] sm:$0xff]  }
  0xcb   :  { %1673 = vmatpush2.bf16.msra.mxu0 %v2722_v63  ;;  %v2814_v63 = vld [vmem:[#allocation5 + $0x40] sm:$0xff]  }
  0xcc   :  { %1698 = vmatpush1.bf16.msra.mxu1 %v2725_v0  ;;  %1674 = vmatprep.subr.bf16.mxu0 %v2730_v1  ;;  %v2815_v0 = vld [vmem:[#allocation5] sm:$0xff]  }
  0xcd   :  { %1699 = vmatprep.subr.bf16.mxu1 %v2733_v6 }
  0xcf   :  { %1675 = vmatpush2.bf16.msra.mxu0 %v2728_v2 }
  0xd0   :  { %1700 = vmatpush1.bf16.msra.mxu1 %v2731_v3  ;;  %1676 = vmatprep.subr.bf16.mxu0 %v2736_v35 }
  0xd1   :  { %1701 = vmatprep.subr.bf16.mxu1 %v2739_v4 }
  0xd3   :  { %1677 = vmatpush2.bf16.msra.mxu0 %v2734_v5 }
  0xd4   :  { %1702 = vmatpush1.bf16.msra.mxu1 %v2737_v8  ;;  %1678 = vmatprep.subr.bf16.mxu0 %v2742_v9  ;;  %v2816_v9 = vld [vmem:[#allocation5 + $0xf8] sm:$0xff]  }
  0xd5   :  { %1703 = vmatprep.subr.bf16.mxu1 %v2745_v10  ;;  %v2817_v10 = vld [vmem:[#allocation5 + $0xb8] sm:$0xff]  }
  0xd7   :  { %1679 = vmatpush2.bf16.msra.mxu0 %v2740_v11  ;;  %v2818_v11 = vld [vmem:[#allocation5 + $0xf0] sm:$0xff]  }
  0xd8   :  { %1704 = vmatpush1.bf16.msra.mxu1 %v2743_v12  ;;  %1680 = vmatprep.subr.bf16.mxu0 %v2748_v13  ;;  %v2819_v12 = vld [vmem:[#allocation5 + $0xb0] sm:$0xff]   ;;  %v2820_v13 = vld [vmem:[#allocation5 + $0xe8] sm:$0xff]  }
  0xd9   :  { %1705 = vmatprep.subr.bf16.mxu1 %v2751_v14  ;;  %v2821_v14 = vld [vmem:[#allocation5 + $0xa8] sm:$0xff]  }
  0xdb   :  { %1681 = vmatpush2.bf16.msra.mxu0 %v2746_v17  ;;  %v2822_v17 = vld [vmem:[#allocation5 + $0xe0] sm:$0xff]  }
  0xdc   :  { %1706 = vmatpush1.bf16.msra.mxu1 %v2749_v18  ;;  %1732 = vmatprep.subr.bf16.mxu0 %v2757_v20  ;;  %v2823_v18 = vld [vmem:[#allocation5 + $0xa0] sm:$0xff]   ;;  %v2825_v20 = vld [vmem:[#allocation5 + $0x98] sm:$0xff]  }
  0xdd   :  { %1707 = vmatprep.subr.bf16.mxu1 %v2754_v19  ;;  %v2824_v19 = vld [vmem:[#allocation5 + $0xd8] sm:$0xff]  }
  0xde   :  { %1683 = vmatmul.mubr.bf16.vlgmr.msra.gmra.mxu0 %v2956_v7  ;;  %v2770_v7 = vld [vmem:[#allocation2 + $0x588] ss:$16 sps:$4 sm:$0xff]  }
  0xdf   :  { %1733 = vmatpush1.bf16.msra.mxu0 %v2755_v22  ;;  %1764 = vmatprep.mubr.bf16.mxu0 %v2904_v16  ;;  %v2779_v16 = vld [vmem:[#allocation2 + $0x668] ss:$16 sps:$4 sm:$0xff]   ;;  %v2827_v22 = vld [vmem:[#allocation5 + $0x90] sm:$0xff]  }
  0xe0   :  { %1708 = vmatpush2.bf16.msra.mxu1 %v2752_v21  ;;  %1734 = vmatprep.subr.bf16.mxu0 %v2763_v24  ;;  %v2826_v21 = vld [vmem:[#allocation5 + $0xd0] sm:$0xff]  }
  0xe1   :  { %1709 = vmatprep.subr.bf16.mxu1 %v2760_v23 }
  0xe3   :  { %1735 = vmatpush1.bf16.msra.mxu0 %v2761_v26  ;;  %v2829_v26 = vld [vmem:[#allocation5 + $0x88] sm:$0xff]  }
  0xe4   :  { %1710 = vmatpush2.bf16.msra.mxu1 %v2758_v25  ;;  %1736 = vmatprep.subr.bf16.mxu0 %v2769_v28  ;;  %v2828_v25 = vld [vmem:[#allocation5 + $0xc8] sm:$0xff]  }
  0xe5   :  { %1711 = vmatprep.subr.bf16.mxu1 %v2766_v27 }
  0xe7   :  { %1737 = vmatpush1.bf16.msra.mxu0 %v2767_v30  ;;  %v2831_v30 = vld [vmem:[#allocation5 + $0x80] sm:$0xff]  }
  0xe8   :  { %1712 = vmatpush2.bf16.msra.mxu1 %v2764_v29  ;;  %1738 = vmatprep.subr.bf16.mxu0 %v2775_v32  ;;  %v2830_v29 = vld [vmem:[#allocation5 + $0xc0] sm:$0xff]  }
  0xe9   :  { %1713 = vmatprep.subr.bf16.mxu1 %v2772_v31  ;;  %v280_v31 = vlaneseq }
  0xeb   :  { %1739 = vmatpush1.bf16.msra.mxu0 %v2773_v33  ;;  %v281_v32 = vshrl.u32 %v280_v31, 7  ;;  %v278_v33 = vld [vmem:[%s3001_s2] sm:$0xf] }
  0xec   :  { %1714 = vmatpush2.bf16.msra.mxu1 %v2770_v7  ;;  %1740 = vmatprep.subr.bf16.mxu0 %v2781_v34 }
  0xed   :  { %1715 = vmatprep.subr.bf16.mxu1 %v2778_v51  ;;  %v282_v7 = vsub.s32 0, %v281_v32  ;;  %v286_v51 = vsub.s32 1, %v281_v32 }
  0xef   :  { %1741 = vmatpush1.bf16.msra.mxu0 %v2779_v16  ;;  %v283_v34 = vrot.slane %v278_v33, %v282_v7 }
  0xf0   :  { %1716 = vmatpush2.bf16.msra.mxu1 %v2776_v36  ;;  %1742 = vmatprep.subr.bf16.mxu0 %v2787_v38  ;;  %v287_v36 = vrot.slane %v278_v33, %v286_v51 }
  0xf1   :  { %1717 = vmatprep.subr.bf16.mxu1 %v2784_v37 }
  0xf3   :  { %1743 = vmatpush1.bf16.msra.mxu0 %v2785_v40 }
  0xf4   :  { %1718 = vmatpush2.bf16.msra.mxu1 %v2782_v39  ;;  %1744 = vmatprep.subr.bf16.mxu0 %v2793_v42 }
  0xf5   :  { %1719 = vmatprep.subr.bf16.mxu1 %v2790_v41 }
  0xf7   :  { %1745 = vmatpush1.bf16.msra.mxu0 %v2791_v45 }
  0xf8   :  { %1720 = vmatpush2.bf16.msra.mxu1 %v2788_v43  ;;  %1746 = vmatprep.subr.bf16.mxu0 %v2799_v48 }
  0xf9   :  { %1721 = vmatprep.subr.bf16.mxu1 %v2796_v46 }
  0xfb   :  { %1747 = vmatpush1.bf16.msra.mxu0 %v2797_v50 }
  0xfc   :  { %1722 = vmatpush2.bf16.msra.mxu1 %v2794_v49  ;;  %2405 = vmatprep.subr.bf16.mxu0 %v2800_v52 }
  0xfd   :  { %2427 = vmatprep.subr.bf16.mxu1 %v2816_v9 }
  0xfe   :  { %1765 = vmatmul.mubr.bf16.vlgmr.msra.gmra.mxu0 %v2974_v44  ;;  %v2812_v44 = vld [vmem:[#allocation5 + $0x48] sm:$0xff]  }
  0xff   :  { %1724 = vmatmul.mubr.bf16.vlgmr.msra.gmra.mxu1 %v2980_v15  ;;  %2406 = vmatpush3.bf16.msra.mxu0 %v2801_v53  ;;  %v2811_v15 = vld [vmem:[#allocation5 + $0x10] sm:$0xff]  }
 0x100   :  { %2407 = vmatprep.subr.bf16.mxu0 %v2802_v54  ;;  %2428 = vmatpush3.bf16.msra.mxu1 %v2817_v10 }
 0x101   :  { %2429 = vmatprep.subr.bf16.mxu1 %v2818_v11 }
 0x103   :  { %2408 = vmatpush3.bf16.msra.mxu0 %v2803_v55 }
 0x104   :  { %2409 = vmatprep.subr.bf16.mxu0 %v2804_v56  ;;  %2430 = vmatpush3.bf16.msra.mxu1 %v2819_v12 }
 0x105   :  { %2431 = vmatprep.subr.bf16.mxu1 %v2820_v13 }
 0x107   :  { %2410 = vmatpush3.bf16.msra.mxu0 %v2805_v57 }
 0x108   :  { %2411 = vmatprep.subr.bf16.mxu0 %v2806_v58  ;;  %2432 = vmatpush3.bf16.msra.mxu1 %v2821_v14 }
 0x109   :  { %2433 = vmatprep.subr.bf16.mxu1 %v2822_v17 }
 0x10b   :  { %2412 = vmatpush3.bf16.msra.mxu0 %v2807_v59 }
 0x10c   :  { %2413 = vmatprep.subr.bf16.mxu0 %v2808_v60  ;;  %2434 = vmatpush3.bf16.msra.mxu1 %v2823_v18 }
 0x10d   :  { %2435 = vmatprep.subr.bf16.mxu1 %v2824_v19 }
 0x10f   :  { %2414 = vmatpush3.bf16.msra.mxu0 %v2809_v61 }
 0x110   :  { %2415 = vmatprep.subr.bf16.mxu0 %v2810_v62  ;;  %2436 = vmatpush3.bf16.msra.mxu1 %v2825_v20 }
 0x111   :  { %2437 = vmatprep.subr.bf16.mxu1 %v2826_v21 }
 0x113   :  { %2416 = vmatpush3.bf16.msra.mxu0 %v2811_v15  ;;  %v290_v15 = vsub.s32 2, %v281_v32 }
 0x114   :  { %2417 = vmatprep.subr.bf16.mxu0 %v2812_v44  ;;  %2438 = vmatpush3.bf16.msra.mxu1 %v2827_v22  ;;  %v294_v44 = vsub.s32 3, %v281_v32 }
 0x115   :  { %2439 = vmatprep.subr.bf16.mxu1 %v2828_v25 }
 0x117   :  { %2418 = vmatpush3.bf16.msra.mxu0 %v2813_v47  ;;  %v291_v47 = vrot.slane %v278_v33, %v290_v15 }
 0x118   :  { %2419 = vmatprep.subr.bf16.mxu0 %v2814_v63  ;;  %2440 = vmatpush3.bf16.msra.mxu1 %v2829_v26  ;;  %v295_v63 = vrot.slane %v278_v33, %v294_v44 }
 0x119   :  { %2441 = vmatprep.subr.bf16.mxu1 %v2830_v29 }
 0x11b   :  { %2420 = vmatpush3.bf16.msra.mxu0 %v2815_v0 }
 0x11c   :  { %2442 = vmatpush3.bf16.msra.mxu1 %v2831_v30 }
 0x11e   :  { %v1479_v1 = vpop.f32.mrf.mxu0 }
 0x11f   :  { %v1520_v6 = vpop.f32.mrf.mxu1  ;;  %v1480_v16 = vadd.f32 %v1479_v1, %v283_v34 }
 0x120   :  { %v1481_v2 = vpop.f32.mrf.mxu0 }
 0x121   :  { %v1522_v3 = vpop.f32.mrf.mxu1  ;;  %v1482_v37 = vadd.f32 %v1481_v2, %v287_v36  ;;  %v1521_v38 = vadd.f32 %v1520_v6, %v1480_v16 }
 0x122   :  { %v1483_v35 = vpop.f32.mrf.mxu0 }
 0x123   :  { %v1524_v4 = vpop.f32.mrf.mxu1  ;;  %v1523_v40 = vadd.f32 %v1522_v3, %v1482_v37 }
 0x124   :  { %v1484_v5 = vpop.f32.mrf.mxu0 }
 0x125   :  { %v1525_v8 = vpop.f32.mrf.mxu1 }
 0x13f   :  { %v1602_v23 = vpop.f32.mrf.mxu1 }
 0x141   :  { %v1604_v24 = vpop.f32.mrf.mxu1 }
 0x143   :  { %v1606_v27 = vpop.f32.mrf.mxu1 }
 0x144   :  { %v2372_v27 = vld [vmem:[%s3003_s4] ss:$0 sm:$0xff] }
 0x145   :  { %v1607_v28 = vpop.f32.mrf.mxu1 }
 0x15e   :  { %v1561_v39 = vpop.f32.mrf.mxu0 }
 0x15f   :  { %v1562_v41 = vadd.f32 %v1561_v39, %v1521_v38 }
 0x160   :  { %v1563_v42 = vpop.f32.mrf.mxu0 }
 0x161   :  { %v1603_v43 = vadd.f32 %v1602_v23, %v1562_v41  ;;  %v1564_v45 = vadd.f32 %v1563_v42, %v1523_v40 }
 0x162   :  { %v1565_v46 = vpop.f32.mrf.mxu0 }
 0x163   :  { %v1605_v48 = vadd.f32 %v1604_v24, %v1564_v45  ;;  %v1773_v49 = vmax.f32 %v1603_v43, 0.0 }
 0x164   :  { %v1566_v50 = vpop.f32.mrf.mxu0 }
 0x165   :  { %v1774_v52 = vmax.f32 %v1605_v48, 0.0  ;;  %v1777_v54 = vpack.c.bf16 %v1773_v49, %v1773_v49 }
 0x167   :  { %v1778_v53 = vpack.c.bf16 %v1774_v52, %v1774_v52 }
 0x169   :  { %2076 = vmatprep.mubr.bf16.mxu0 %v1778_v53 }
 0x16a   :  { %2077 = vmatmul.mubr.bf16.vlgmr.msra.gmra.mxu0 %v1777_v54 }
 0x17f   :  { %v1643_v55 = vpop.f32.mrf.mxu1 }
 0x180   :  { %v1644_v0 = vadd.f32 %v1643_v55, %v291_v47 }
 0x181   :  { %v1645_v56 = vpop.f32.mrf.mxu1 }
 0x182   :  { %v1646_v1 = vadd.f32 %v1645_v56, %v295_v63 }
 0x183   :  { %v1647_v57 = vpop.f32.mrf.mxu1 }
 0x185   :  { %v1648_v58 = vpop.f32.mrf.mxu1 }
 0x19e   :  { %v1684_v59 = vpop.f32.mrf.mxu0 }
 0x19f   :  { %v1685_v6 = vadd.f32 %v1684_v59, %v1644_v0 }
 0x1a0   :  { %v1686_v60 = vpop.f32.mrf.mxu0 }
 0x1a1   :  { %v1687_v35 = vadd.f32 %v1686_v60, %v1646_v1 }
 0x1a2   :  { %v1688_v61 = vpop.f32.mrf.mxu0 }
 0x1a4   :  { %v1689_v62 = vpop.f32.mrf.mxu0 }
 0x1be   :  { %v1766_v3 = vpop.f32.mrf.mxu0 }
 0x1bf   :  { %v1725_v2 = vpop.f32.mrf.mxu1 }
 0x1c0   :  { %v1726_v4 = vadd.f32 %v1725_v2, %v1685_v6  ;;  %v1768_v8 = vpop.f32.mrf.mxu0 }
 0x1c1   :  { %v1727_v5 = vpop.f32.mrf.mxu1 }
 0x1c2   :  { %v1767_v9 = vadd.f32 %v1766_v3, %v1726_v4  ;;  %v1728_v10 = vadd.f32 %v1727_v5, %v1687_v35  ;;  %v1770_v12 = vpop.f32.mrf.mxu0 }
 0x1c3   :  { %v1729_v11 = vpop.f32.mrf.mxu1 }
 0x1c4   :  { %v1769_v13 = vadd.f32 %v1768_v8, %v1728_v10  ;;  %v1775_v14 = vmax.f32 %v1767_v9, 0.0  ;;  %v1771_v18 = vpop.f32.mrf.mxu0 }
 0x1c5   :  { %v1730_v17 = vpop.f32.mrf.mxu1 }
 0x1c6   :  { %v1776_v19 = vmax.f32 %v1769_v13, 0.0  ;;  %v1779_v21 = vpack.c.bf16 %v1775_v14, %v1775_v14 }
 0x1c8   :  { %v1780_v20 = vpack.c.bf16 %v1776_v19, %v1776_v19 }
 0x1ca   :  { %2116 = vmatprep.mubr.bf16.mxu1 %v1780_v20 }
 0x1cb   :  { %2117 = vmatmul.mubr.bf16.vlgmr.msra.gmra.mxu1 %v1779_v21 }
 0x22a   :  { %v2421_v22 = vpop.f32.mrf.mxu0 }
 0x22c   :  { %v2422_v23 = vpop.f32.mrf.mxu0 }
 0x22d   :  { %v2423_v24 = vadd.f32 %v2422_v23, %v2421_v22 }
 0x22e   :  { %v2424_v25 = vpop.f32.mrf.mxu0 }
 0x22f   :  { %v2079_v30 = vadd.f32 %v2423_v24, %v2372_v27 }
 0x230   :  { %v2425_v26 = vpop.f32.mrf.mxu0 }
 0x28b   :  { %v2443_v28 = vpop.f32.mrf.mxu1 }
 0x28d   :  { %v2444_v29 = vpop.f32.mrf.mxu1 }
 0x28e   :  { %v2445_v31 = vadd.f32 %v2444_v29, %v2443_v28 }
 0x28f   :  { %v2446_v32 = vpop.f32.mrf.mxu1 }
 0x290   :  { %v2119_v7 = vadd.f32 %v2445_v31, %v2079_v30 }
 0x291   :  { %v2447_v33 = vpop.f32.mrf.mxu1 }
 0x292   :  { %2124 = vst [vmem:[#allocation7] sm:$0xff] %v2119_v7 }
 0x293   :  { %2883 = shalt.err (!%p2880_p0)
}
 0x294   :  { %2134 = dma.vmem_to_hbm [thread:$0]  %s2132_s16, 128, %s3004_s5, [#allocation4]  }
 0x295   :  { %2896 = dma.done.wait [#allocation4], 128  }
 0x296   :  { %2897 = vsyncadd [#allocation4], 4294967168 }
 0x297   :  { %2138 = vsyncpa [#allocation3], 1 }
 0x298   :  { %2139 = vsyncpa [#allocation6], 1 }
 0x299   :  { %2140 = vsyncpa [#allocation4], 1 }

</bundles_post_ra>
